<compile_context>
chip_gen: v7x
topology: tpu7x:2x2x1
jax: 0.10.0
libtpu: 0.0.40
codegen_flags: <defaults>
</compile_context>

<pallas_src>
import math

import jax
import jax.numpy as jnp
from jax.experimental import pallas as pl
from jax.experimental.pallas import tpu as pltpu

_LANE = 128


def _round_up(n, m):
    return ((n + m - 1) // m) * m


# ---------------------------------------------------------------------------
# Fully fused MultiHeadSENet kernel (transposed / batch-on-lane orientation)
# ---------------------------------------------------------------------------
def _mhse_kernel(xt_ref, ws_ref, bs_ref, bd1_ref, bd2_ref, wc_ref, bc_ref,
                 ot_ref):
    # x^T tile: [f_in, bb]  (batch on the lane axis -> lane-dense everywhere)
    xt = xt_ref[...].astype(jnp.float32)

    # split_layer (transposed): h^T = W_split @ x^T + b_split      [emb, bb]
    h = jnp.dot(ws_ref[...], xt, preferred_element_type=jnp.float32)
    h = h + bs_ref[...]

    # SELayer over the head axis, expressed on the flat emb dimension via
    # block-diagonal weights (exact reformulation of the per-head Linears).
    z = jnp.dot(bd1_ref[...], h, preferred_element_type=jnp.float32)
    z = jnp.maximum(z, 0.0)                              # ReLU       [dk*h2, bb]
    g = jnp.dot(bd2_ref[...], z, preferred_element_type=jnp.float32)
    g = jax.nn.sigmoid(g)                                # EUP exp + reciprocal
    h = g * h                                            # SE gating: y * x

    # concat_layer (transposed): y^T = W_concat @ h^T + b_concat    [f_in, bb]
    y = jnp.dot(wc_ref[...], h, preferred_element_type=jnp.float32)
    y = y + bc_ref[...]

    ot_ref[...] = y.astype(ot_ref.dtype)


def _choose_block_b(batch, block_b):
    """Lane-aligned batch tile; >=2 grid steps when possible (v7x megacore)."""
    if batch <= _LANE:
        return batch                      # single full-extent tile (tiny demo)
    bb = min(block_b, _round_up(pl.cdiv(batch, 2), _LANE))
    return max(_LANE, (bb // _LANE) * _LANE)


def _vmem_estimate_bytes(bb, f_in, emb, hid, io_itemsize):
    io = 2 * 2 * bb * f_in * io_itemsize              # double-buffered x/y tiles
    work = bb * (2 * emb + hid + f_in) * 4            # h, g, z, y live f32 sets
    weights = 4 * (2 * emb * f_in + 2 * hid * emb + emb + f_in)
    return io + work + weights


def multi_head_senet_forward(params, x, *, block_b=4096, out_dtype=None):
    """x: [B, input_shape] -> [B, input_shape]. x/out may be f32 or bf16."""
    B, f_in = x.shape
    out_dtype = x.dtype if out_dtype is None else out_dtype
    emb = params["ws"].shape[0]
    hid = params["bd1"].shape[0]

    bb = _choose_block_b(B, block_b)
    grid = (pl.cdiv(B, bb),)

    # Layout plumbing only: put batch on the lane axis for the kernel.
    x_t = x.T                                            # [f_in, B]

    def resident(arr):
        # Weight / bias tiles: full array, same block for every grid step.
        return pl.BlockSpec(arr.shape, lambda i: (0, 0))

    in_specs = [
        pl.BlockSpec((f_in, bb), lambda i: (0, i)),      # x^T (batch-tiled, lane-dense)
        resident(params["ws"]),
        resident(params["bs"]),
        resident(params["bd1"]),
        resident(params["bd2"]),
        resident(params["wc"]),
        resident(params["bc"]),
    ]
    out_specs = pl.BlockSpec((f_in, bb), lambda i: (0, i))

    est = _vmem_estimate_bytes(bb, f_in, emb, hid, jnp.dtype(x.dtype).itemsize)
    # Cap well below v7x's 64 MiB physical VMEM; floor at the 32 MiB default.
    vmem_limit = int(min(48 * 2**20, max(32 * 2**20, 2 * est)))

    y_t = pl.pallas_call(
        _mhse_kernel,
        out_shape=jax.ShapeDtypeStruct((f_in, B), out_dtype),
        grid=grid,
        in_specs=in_specs,
        out_specs=out_specs,
        compiler_params=pltpu.CompilerParams(
            dimension_semantics=("parallel",),
            vmem_limit_bytes=vmem_limit),
    )(x_t, params["ws"], params["bs"], params["bd1"], params["bd2"],
      params["wc"], params["bc"])
    return y_t.T


# ---------------------------------------------------------------------------
# Parameter construction (deterministic; mimics PyTorch nn.Linear init shapes)
# ---------------------------------------------------------------------------
def make_params(key, input_shape, emb_shape, head_num):
    assert emb_shape % head_num == 0, "emb_shape can't split by head_num"
    dk = emb_shape // head_num
    h2 = head_num // 2
    ks = jax.random.split(key, 6)

    def unif(k, shape, fan_in):
        bound = 1.0 / math.sqrt(float(fan_in))
        return jax.random.uniform(k, shape, jnp.float32, -bound, bound)

    # PyTorch layouts: Linear weight is [out, in].
    w_split = unif(ks[0], (emb_shape, input_shape), input_shape)
    b_split = unif(ks[1], (emb_shape,), input_shape)
    w1 = unif(ks[2], (h2, head_num), head_num)           # SELayer fc[0], no bias
    w2 = unif(ks[3], (head_num, h2), h2)                 # SELayer fc[2], no bias
    w_concat = unif(ks[4], (input_shape, emb_shape), emb_shape)
    b_concat = unif(ks[5], (input_shape,), emb_shape)

    # Kernel-friendly (transposed-math) forms:
    #   h^T = W_split @ x^T ; gate^T = sigmoid(kron(I,W2) @ relu(kron(I,W1) @ h^T))
    eye = jnp.eye(dk, dtype=jnp.float32)
    return dict(
        ws=w_split,                                      # [emb, F_in]
        bs=b_split[:, None],                             # [emb, 1]
        bd1=jnp.kron(eye, w1),                           # [dk*h2, emb]
        bd2=jnp.kron(eye, w2),                           # [emb, dk*h2]
        wc=w_concat,                                     # [F_in, emb]
        bc=b_concat[:, None],                            # [F_in, 1]
        _raw=dict(w_split=w_split, b_split=b_split, w1=w1, w2=w2,
                  w_concat=w_concat, b_concat=b_concat),
    )


# ---------------------------------------------------------------------------
# Pure-JAX reference (mirrors the PyTorch forward exactly, incl. view())
# ---------------------------------------------------------------------------
def ref_forward(raw, x, head_num):
    b = x.shape[0]
    h = x @ raw["w_split"].T + raw["b_split"]
    emb = h.shape[1]
    dk = emb // head_num
    h3 = h.reshape(b, dk, head_num)
    z = jnp.maximum(h3 @ raw["w1"].T, 0.0)
    gate = 1.0 / (1.0 + jnp.exp(-(z @ raw["w2"].T)))
    h3 = gate * h3
    h = h3.reshape(b, emb)
    return h @ raw["w_concat"].T + raw["b_concat"]


# ---------------------------------------------------------------------------
if __name__ == "__main__":
    batch = 4
    input_shape = 16
    emb_shape = 32
    head_num = 8          # dk = emb_shape // head_num = 4

    key = jax.random.PRNGKey(0)
    k_params, k_x = jax.random.split(key)

    params = make_params(k_params, input_shape, emb_shape, head_num)
    x = jax.random.normal(k_x, (batch, input_shape), jnp.float32)

    # --- small f32 path (single full-extent tile) ---
    out = jax.block_until_ready(multi_head_senet_forward(params, x))
    ref = ref_forward(params["_raw"], x, head_num)
    assert out.shape == (batch, input_shape), out.shape
    assert bool(jnp.all(jnp.isfinite(out)))
    assert bool(jnp.allclose(out, ref, atol=1e-5, rtol=1e-5)), \
        float(jnp.max(jnp.abs(out - ref)))

    # --- larger batch: lane-aligned tiles, grid >= 2 (megacore path) ---
    big_b = 512
    xb = jax.random.normal(jax.random.PRNGKey(1), (big_b, input_shape),
                           jnp.float32)
    out_big = jax.block_until_ready(multi_head_senet_forward(params, xb))
    ref_big = ref_forward(params["_raw"], xb, head_num)
    assert out_big.shape == (big_b, input_shape)
    assert bool(jnp.allclose(out_big, ref_big, atol=1e-5, rtol=1e-5)), \
        float(jnp.max(jnp.abs(out_big - ref_big)))

    # --- bf16 HBM I/O path (mem-bound roofline: halves x/y traffic) ---
    out_bf16 = jax.block_until_ready(
        multi_head_senet_forward(params, x.astype(jnp.bfloat16),
                                 out_dtype=jnp.bfloat16))
    assert out_bf16.shape == (batch, input_shape)
    assert bool(jnp.all(jnp.isfinite(out_bf16.astype(jnp.float32))))
    assert bool(jnp.allclose(out_bf16.astype(jnp.float32), ref,
                             atol=1e-1, rtol=1e-1))

    print("KERNEL_OK")
</pallas_src>

<mosaic_0001>
module attributes {stable_mosaic.version = 11 : i64} {
  func.func @_mhse_kernel(%arg0: i32, %arg1: memref<16x4xf32, #tpu.memory_space<vmem>>, %arg2: memref<32x16xf32, #tpu.memory_space<vmem>>, %arg3: memref<32x1xf32, #tpu.memory_space<vmem>>, %arg4: memref<16x32xf32, #tpu.memory_space<vmem>>, %arg5: memref<32x16xf32, #tpu.memory_space<vmem>>, %arg6: memref<16x32xf32, #tpu.memory_space<vmem>>, %arg7: memref<16x1xf32, #tpu.memory_space<vmem>>, %arg8: memref<16x4xf32, #tpu.memory_space<vmem>>) attributes {dimension_semantics = [#tpu.dimension_semantics<parallel>], iteration_bounds = array<i64: 1>, scalar_prefetch = 0 : i64, scratch_operands = 0 : i64, tpu.core_type = #tpu.core_type<tc>, window_params = [{transform_indices = @transform_0, window_bounds = array<i64: 16, 4>}, {pipeline_mode = #tpu.pipeline_mode<synchronous>, transform_indices = @transform_1, window_bounds = array<i64: 32, 16>}, {pipeline_mode = #tpu.pipeline_mode<synchronous>, transform_indices = @transform_2, window_bounds = array<i64: 32, 1>}, {pipeline_mode = #tpu.pipeline_mode<synchronous>, transform_indices = @transform_3, window_bounds = array<i64: 16, 32>}, {pipeline_mode = #tpu.pipeline_mode<synchronous>, transform_indices = @transform_4, window_bounds = array<i64: 32, 16>}, {pipeline_mode = #tpu.pipeline_mode<synchronous>, transform_indices = @transform_5, window_bounds = array<i64: 16, 32>}, {pipeline_mode = #tpu.pipeline_mode<synchronous>, transform_indices = @transform_6, window_bounds = array<i64: 16, 1>}, {transform_indices = @transform_7, window_bounds = array<i64: 16, 4>}]} {
    %c0 = arith.constant 0 : index
    %c0_0 = arith.constant 0 : index
    %0 = vector.load %arg1[%c0, %c0_0] : memref<16x4xf32, #tpu.memory_space<vmem>>, vector<16x4xf32>
    %c0_1 = arith.constant 0 : index
    %c0_2 = arith.constant 0 : index
    %1 = vector.load %arg2[%c0_1, %c0_2] : memref<32x16xf32, #tpu.memory_space<vmem>>, vector<32x16xf32>
    %cst = arith.constant dense<0.000000e+00> : vector<32x4xf32>
    %2 = tpu.matmul %1, %0, %cst {dimension_numbers = #tpu.dot_dimension_numbers<[1], [0], [0], [1], [0, 0, 1, 1], [], []>} : vector<32x16xf32>, vector<16x4xf32>, vector<32x4xf32> -> vector<32x4xf32>
    %c0_3 = arith.constant 0 : index
    %c0_4 = arith.constant 0 : index
    %3 = vector.load %arg3[%c0_3, %c0_4] : memref<32x1xf32, #tpu.memory_space<vmem>>, vector<32x1xf32>
    %4 = vector.broadcast %3 : vector<32x1xf32> to vector<32x4xf32>
    %5 = arith.addf %2, %4 : vector<32x4xf32>
    %c0_5 = arith.constant 0 : index
    %c0_6 = arith.constant 0 : index
    %6 = vector.load %arg4[%c0_5, %c0_6] : memref<16x32xf32, #tpu.memory_space<vmem>>, vector<16x32xf32>
    %cst_7 = arith.constant dense<0.000000e+00> : vector<16x4xf32>
    %7 = tpu.matmul %6, %5, %cst_7 {dimension_numbers = #tpu.dot_dimension_numbers<[1], [0], [0], [1], [0, 0, 1, 1], [], []>} : vector<16x32xf32>, vector<32x4xf32>, vector<16x4xf32> -> vector<16x4xf32>
    %cst_8 = arith.constant 0.000000e+00 : f32
    %8 = vector.broadcast %cst_8 : f32 to vector<16x4xf32>
    %9 = arith.maximumf %7, %8 : vector<16x4xf32>
    %c0_9 = arith.constant 0 : index
    %c0_10 = arith.constant 0 : index
    %10 = vector.load %arg5[%c0_9, %c0_10] : memref<32x16xf32, #tpu.memory_space<vmem>>, vector<32x16xf32>
    %cst_11 = arith.constant dense<0.000000e+00> : vector<32x4xf32>
    %11 = tpu.matmul %10, %9, %cst_11 {dimension_numbers = #tpu.dot_dimension_numbers<[1], [0], [0], [1], [0, 0, 1, 1], [], []>} : vector<32x16xf32>, vector<16x4xf32>, vector<32x4xf32> -> vector<32x4xf32>
    %12 = arith.negf %11 : vector<32x4xf32>
    %13 = math.exp %12 : vector<32x4xf32>
    %cst_12 = arith.constant 1.000000e+00 : f32
    %14 = vector.broadcast %cst_12 : f32 to vector<32x4xf32>
    %15 = arith.addf %14, %13 : vector<32x4xf32>
    %16 = arith.divf %14, %15 : vector<32x4xf32>
    %17 = arith.mulf %16, %5 : vector<32x4xf32>
    %c0_13 = arith.constant 0 : index
    %c0_14 = arith.constant 0 : index
    %18 = vector.load %arg6[%c0_13, %c0_14] : memref<16x32xf32, #tpu.memory_space<vmem>>, vector<16x32xf32>
    %cst_15 = arith.constant dense<0.000000e+00> : vector<16x4xf32>
    %19 = tpu.matmul %18, %17, %cst_15 {dimension_numbers = #tpu.dot_dimension_numbers<[1], [0], [0], [1], [0, 0, 1, 1], [], []>} : vector<16x32xf32>, vector<32x4xf32>, vector<16x4xf32> -> vector<16x4xf32>
    %c0_16 = arith.constant 0 : index
    %c0_17 = arith.constant 0 : index
    %20 = vector.load %arg7[%c0_16, %c0_17] : memref<16x1xf32, #tpu.memory_space<vmem>>, vector<16x1xf32>
    %21 = vector.broadcast %20 : vector<16x1xf32> to vector<16x4xf32>
    %22 = arith.addf %19, %21 : vector<16x4xf32>
    %c0_18 = arith.constant 0 : index
    %c0_19 = arith.constant 0 : index
    %23 = vector.load %arg8[%c0_18, %c0_19] : memref<16x4xf32, #tpu.memory_space<vmem>>, vector<16x4xf32>
    tpu.vector_store %arg8[%c0_18, %c0_19], %22 {strides = array<i32>} : memref<16x4xf32, #tpu.memory_space<vmem>>, vector<16x4xf32>,
    return
  }
  func.func @transform_0(%arg0: i32) -> (i32, i32) {
    %c0_i32 = arith.constant 0 : i32
    %c0_i32_0 = arith.constant 0 : i32
    return %c0_i32, %arg0 : i32, i32
  }
  func.func @transform_1(%arg0: i32) -> (i32, i32) {
    %c0_i32 = arith.constant 0 : i32
    %c0_i32_0 = arith.constant 0 : i32
    %c0_i32_1 = arith.constant 0 : i32
    return %c0_i32, %c0_i32_0 : i32, i32
  }
  func.func @transform_2(%arg0: i32) -> (i32, i32) {
    %c0_i32 = arith.constant 0 : i32
    %c0_i32_0 = arith.constant 0 : i32
    %c0_i32_1 = arith.constant 0 : i32
    return %c0_i32, %c0_i32_0 : i32, i32
  }
  func.func @transform_3(%arg0: i32) -> (i32, i32) {
    %c0_i32 = arith.constant 0 : i32
    %c0_i32_0 = arith.constant 0 : i32
    %c0_i32_1 = arith.constant 0 : i32
    return %c0_i32, %c0_i32_0 : i32, i32
  }
  func.func @transform_4(%arg0: i32) -> (i32, i32) {
    %c0_i32 = arith.constant 0 : i32
    %c0_i32_0 = arith.constant 0 : i32
    %c0_i32_1 = arith.constant 0 : i32
    return %c0_i32, %c0_i32_0 : i32, i32
  }
  func.func @transform_5(%arg0: i32) -> (i32, i32) {
    %c0_i32 = arith.constant 0 : i32
    %c0_i32_0 = arith.constant 0 : i32
    %c0_i32_1 = arith.constant 0 : i32
    return %c0_i32, %c0_i32_0 : i32, i32
  }
  func.func @transform_6(%arg0: i32) -> (i32, i32) {
    %c0_i32 = arith.constant 0 : i32
    %c0_i32_0 = arith.constant 0 : i32
    %c0_i32_1 = arith.constant 0 : i32
    return %c0_i32, %c0_i32_0 : i32, i32
  }
  func.func @transform_7(%arg0: i32) -> (i32, i32) {
    %c0_i32 = arith.constant 0 : i32
    %c0_i32_0 = arith.constant 0 : i32
    return %c0_i32, %arg0 : i32, i32
  }
}

</mosaic_0001>

<bundles_post_ra>
// kernel: tpu_custom_call.1
= control target key start
LH: loop header
LB: loop body
LE: loop exit
PB: predicated region body
PF: predicated region fallthrough
CT: control target
= control target key end

     0   :  { %vm56_vm0 = vcmask 130048   ;;  %v596_v3 = vmov 0   ;;  %vm156_vm1 = vcmask 261120   ;;  %vm464_vm2 = vcmask 31744   ;;  %s715_s0 = inlined_call_operand.vmem [shape: f32[16,4], index: 0, kind: input, shape index: {}]   ;;  %s716_s1 = inlined_call_operand.vmem [shape: f32[32,16], index: 1, kind: input, shape index: {}]   ;;  %s717_s2 = inlined_call_operand.vmem [shape: f32[32,1], index: 2, kind: input, shape index: {}]   ;;  %s718_s6 = inlined_call_operand.vmem [shape: f32[16,1], index: 6, kind: input, shape index: {}]   ;;  %s719_s3 = inlined_call_operand.vmem [shape: f32[16,32], index: 3, kind: input, shape index: {}]   ;;  %s720_s4 = inlined_call_operand.vmem [shape: f32[32,16], index: 4, kind: input, shape index: {}]   ;;  %s721_s5 = inlined_call_operand.vmem [shape: f32[16,32], index: 5, kind: input, shape index: {}]   ;;  %s722_s7 = inlined_call_operand.vmem [shape: f32[16,4], index: 7, kind: output, shape index: {}]  }
   0x1   :  { %v26_v0 = vld [vmem:[%s715_s0] sm:$0xff]  ;;  %v27_v1 = vld [vmem:[%s715_s0 + $0x8] sm:$0xff]  ;;  %578 = vset.pattern.permute.xlu0 %v596_v3  ;;  %579 = vset.pattern.permute.xlu1 %v596_v3  ;;  %v34_v6 = vld [vmem:[%s717_s2 + $0x10] sm:$0xff] }
   0x2   :  { %v28_v2 = vld [vmem:[%s716_s1] sm:$0xff]  ;;  %v553_v4 = vpack.c.bf16 %v27_v1, %v26_v0  ;;  %v29_v7 = vld [vmem:[%s716_s1 + $0x8] sm:$0xff]  ;;  %48 = vperm.xlu1 %579, %v34_v6   ;;  %v30_v9 = vld [vmem:[%s716_s1 + $0x10] sm:$0xff] }
   0x3   :  { %515 = vmatprep.mubr.msk.f32.mxu0 %vm56_vm0, %v28_v2  ;;  %v32_v5 = vld [vmem:[%s717_s2] sm:$0xff]  ;;  %v33_v8 = vld [vmem:[%s717_s2 + $0x8] sm:$0xff]  ;;  %v35_v10 = vld [vmem:[%s717_s2 + $0x18] sm:$0xff] }
   0x4   :  { %554 = vmatprep.subr.bf16.mxu0 %v553_v4  ;;  %38 = vperm.xlu0 %578, %v32_v5   ;;  %v31_v11 = vld [vmem:[%s716_s1 + $0x18] sm:$0xff]  ;;  %v371_v12 = vld [vmem:[%s718_s6] sm:$0xff]  ;;  %v372_v13 = vld [vmem:[%s718_s6 + $0x8] sm:$0xff] }
   0x5   :  { %556 = vmatpush3.bf16.msra.mxu0 %v553_v4  ;;  %v154_v14 = vld [vmem:[%s719_s3] sm:$0xff]  ;;  %v155_v29 = vld [vmem:[%s719_s3 + $0x8] sm:$0xff]  ;;  %v242_v37 = vld [vmem:[%s720_s4 + $0x10] sm:$0xff] }
   0x6   :  { %53 = vperm.xlu1 %579, %v35_v10   ;;  %529 = vmatprep.mubr.msk.f32.mxu1 %vm156_vm1, %v154_v14  ;;  %v240_v30 = vld [vmem:[%s720_s4] sm:$0xff]  ;;  %v241_v36 = vld [vmem:[%s720_s4 + $0x8] sm:$0xff]  ;;  %v243_v38 = vld [vmem:[%s720_s4 + $0x18] sm:$0xff] }
   0x7   :  { %v369_v39 = vld [vmem:[%s721_s5] sm:$0xff]  ;;  %v370_v2 = vld [vmem:[%s721_s5 + $0x8] sm:$0xff] }
   0x8   :  { %516 = vmatmul.mubr.msk.f32.vlgmr.msra.gmra.mrb[0].mxu0 %vm56_vm0, %v29_v7  ;;  %43 = vperm.xlu0 %578, %v33_v8  }
   0x9   :  { %518 = vmatprep.mubr.msk.f32.mxu0 %vm56_vm0, %v30_v9 }
   0xa   :  { %380 = vperm.xlu1 %579, %v372_v13  }
   0xc   :  { %519 = vmatmul.mubr.msk.f32.gmra.mrb[2].mxu0 %vm56_vm0, %v31_v11  ;;  %375 = vperm.xlu0 %578, %v371_v12  }
   0xd   :  { %536 = vmatprep.mubr.msk.f32.mxu0 %vm56_vm0, %v240_v30 }
  0x81   :  { %v49_v16 = vpop.permute.xlu1 %48 }
  0x83   :  { %v39_v15 = vpop.permute.xlu0 %38 }
  0x85   :  { %v54_v22 = vpop.permute.xlu1 %53 }
  0x87   :  { %v44_v17 = vpop.permute.xlu0 %43 }
  0x89   :  { %v381_v3 = vpop.permute.xlu1 %380 }
  0x8b   :  { %v376_v5 = vpop.permute.xlu0 %375 }
  0xdb   :  { %v517_v18 = vpop.f32.mrb[0].mxu0 }
  0xdc   :  { %v141_v19 = vadd.f32 %v517_v18, %v44_v17  ;;  %v135_v20 = vpop.f32.mrb[1].mxu0 }
  0xdd   :  { %v136_v21 = vadd.f32 %v135_v20, %v39_v15 }
  0xdf   :  { %v520_v23 = vpop.f32.mrb[2].mxu0  ;;  %v557_v24 = vpack.c.bf16 %v141_v19, %v136_v21 }
  0xe0   :  { %v151_v25 = vadd.f32 %v520_v23, %v54_v22  ;;  %v145_v26 = vpop.f32.mrb[3].mxu0 }
  0xe1   :  { %v146_v27 = vadd.f32 %v145_v26, %v49_v16  ;;  %558 = vmatprep.subr.bf16.mxu1 %v557_v24 }
  0xe2   :  { %560 = vmatpush3.bf16.msra.mxu1 %v557_v24 }
  0xe3   :  { %v561_v28 = vpack.c.bf16 %v151_v25, %v146_v27 }
  0xe5   :  { %562 = vmatprep.subr.bf16.mxu1 %v561_v28 }
  0xe6   :  { %564 = vmatpush3.bf16.msra.mxu1 %v561_v28 }
  0xe9   :  { %530 = vmatmul.mubr.msk.f32.vlgmr.msra.gmra.mrb[0].mxu1 %vm156_vm1, %v155_v29 }
  0xea   :  { %550 = vmatprep.mubr.msk.f32.mxu1 %vm156_vm1, %v369_v39 }
 0x1bc   :  { %v531_v31 = vpop.f32.mrb[0].mxu1 }
 0x1bd   :  { %v239_v32 = vmax.f32 %v531_v31, 0.0  ;;  %v229_v33 = vpop.f32.mrb[1].mxu1 }
 0x1be   :  { %v238_v34 = vmax.f32 %v229_v33, 0.0 }
 0x1c0   :  { %v565_v35 = vpack.c.bf16 %v239_v32, %v238_v34 }
 0x1c2   :  { %566 = vmatprep.subr.bf16.mxu0 %v565_v35 }
 0x1c3   :  { %568 = vmatpush3.bf16.msra.mxu0 %v565_v35 }
 0x1c6   :  { %537 = vmatmul.mubr.msk.f32.vlgmr.msra.gmra.mrb[4].mxu0 %vm56_vm0, %v241_v36 }
 0x1c7   :  { %539 = vmatprep.mubr.msk.f32.mxu0 %vm56_vm0, %v242_v37 }
 0x1ca   :  { %540 = vmatmul.mubr.msk.f32.gmra.mrb[6].mxu0 %vm56_vm0, %v243_v38 }
 0x299   :  { %v538_v40 = vpop.f32.mrb[4].mxu0 }
 0x29a   :  { %v482_v41 = vmul.f32 -1.442695, %v538_v40  ;;  %v322_v42 = vpop.f32.mrb[5].mxu0 }
 0x29b   :  { %v481_v43 = vmul.f32 -1.442695, %v322_v42 }
 0x29c   :  { %580 = vpow2.f32 %v482_v41 }
 0x29d   :  { %582 = vpow2.f32 %v481_v43  ;;  %v541_v44 = vpop.f32.mrb[6].mxu0 }
 0x29e   :  { %v484_v45 = vmul.f32 -1.442695, %v541_v44  ;;  %v332_v46 = vpop.f32.mrb[7].mxu0 }
 0x29f   :  { %v483_v47 = vmul.f32 -1.442695, %v332_v46 }
 0x2a0   :  { %584 = vpow2.f32 %v484_v45 }
 0x2a1   :  { %586 = vpow2.f32 %v483_v47 }
 0x2a6   :  { %v581_v48 = vpop.eup %580 }
 0x2a7   :  { %v583_v49 = vpop.eup %582  ;;  %v354_v50 = vadd.f32 1.0, %v581_v48 }
 0x2a8   :  { %v353_v51 = vadd.f32 1.0, %v583_v49 }
 0x2a9   :  { %588 = vrcp.f32 %v354_v50 }
 0x2aa   :  { %v585_v52 = vpop.eup %584  ;;  %590 = vrcp.f32 %v353_v51 }
 0x2ab   :  { %v587_v53 = vpop.eup %586  ;;  %v356_v54 = vadd.f32 1.0, %v585_v52 }
 0x2ac   :  { %v355_v55 = vadd.f32 1.0, %v587_v53 }
 0x2ad   :  { %592 = vrcp.f32 %v356_v54 }
 0x2ae   :  { %594 = vrcp.f32 %v355_v55 }
 0x2b3   :  { %v589_v56 = vpop.eup %588 }
 0x2b4   :  { %v591_v57 = vpop.eup %590  ;;  %v366_v58 = vmul.f32 %v589_v56, %v141_v19 }
 0x2b5   :  { %v365_v59 = vmul.f32 %v591_v57, %v136_v21 }
 0x2b7   :  { %v593_v60 = vpop.eup %592  ;;  %v569_v61 = vpack.c.bf16 %v366_v58, %v365_v59 }
 0x2b8   :  { %v595_v62 = vpop.eup %594  ;;  %v368_v63 = vmul.f32 %v593_v60, %v151_v25 }
 0x2b9   :  { %570 = vmatprep.subr.bf16.mxu1 %v569_v61  ;;  %v367_v0 = vmul.f32 %v595_v62, %v146_v27 }
 0x2ba   :  { %572 = vmatpush3.bf16.msra.mxu1 %v569_v61 }
 0x2bb   :  { %v573_v1 = vpack.c.bf16 %v368_v63, %v367_v0 }
 0x2bd   :  { %574 = vmatprep.subr.bf16.mxu1 %v573_v1 }
 0x2be   :  { %576 = vmatpush3.bf16.msra.mxu1 %v573_v1 }
 0x2c1   :  { %551 = vmatmul.mubr.msk.f32.vlgmr.msra.gmra.mrb[2].mxu1 %vm156_vm1, %v370_v2 }
 0x394   :  { %v552_v4 = vpop.f32.mrb[2].mxu1 }
 0x395   :  { %v461_v6 = vadd.f32 %v552_v4, %v381_v3  ;;  %v455_v7 = vpop.f32.mrb[3].mxu1 }
 0x396   :  { %v456_v8 = vadd.f32 %v455_v7, %v376_v5 }
 0x397   :  { %466 = vst.msk [vmem:[%s722_s7 + $0x8] sm:$0xff] %vm464_vm2, %v461_v6 }
 0x398   :  { %465 = vst.msk [vmem:[%s722_s7] sm:$0xff] %vm464_vm2, %v456_v8 }

</bundles_post_ra>
